<compile_context>
chip_gen: v6e
topology: v6e:2x2x1
jax: 0.10.0
libtpu: 0.0.40
codegen_flags: <defaults>
</compile_context>

<pallas_src>
import functools

import jax
import jax.numpy as jnp
from jax.experimental import pallas as pl
from jax.experimental.pallas import tpu as pltpu


def _round_up(x, m):
    return ((x + m - 1) // m) * m


def _cdiv(a, b):
    return (a + b - 1) // b


def _vmem_capacity_bytes():
    cap = 64 << 20   # conservative fallback: v7x per-TensorCore VMEM
    try:
        info = pltpu.get_tpu_info()
        cap = int(getattr(info, "vmem_capacity_bytes", cap))
    except Exception:
        pass
    return cap


def _tile_bytes(rows, cols, dtype):
    it = jnp.dtype(dtype).itemsize
    sub = max(8, 32 // it)
    return _round_up(max(rows, 1), sub) * _round_up(max(cols, 1), 128) * it


def _simclr_head_kernel(x_ref, w1_ref, b1_ref, w2_ref, b2_ref, o_ref, acc_ref,
                        *, inv_hw, hw_chunk, hw_last):
    # x_ref: (TN, C, HW_CHUNK)   w1: (C, HID)   b1: (1, HID)
    # w2: (HID, CLS)             b2: (1, CLS)
    # o_ref: (TN, CLS)           acc_ref: (TN, C, 128) f32 scratch
    k = pl.program_id(1)
    nk = pl.num_programs(1)

    @pl.when(k == 0)
    def _():
        acc_ref[...] = jnp.zeros_like(acc_ref)

    def accumulate(width):
        # Per-lane accumulation: plain VPU adds of static 128-lane slices into
        # the accumulator; no cross-lane (XLU) work on the streaming path.
        n_full, rem = divmod(width, 128)
        for j in range(n_full):
            acc_ref[...] += x_ref[:, :, j * 128:(j + 1) * 128].astype(jnp.float32)
        if rem:
            acc_ref[:, :, :rem] += (
                x_ref[:, :, n_full * 128:n_full * 128 + rem].astype(jnp.float32))

    if hw_last == hw_chunk:          # chunks divide HW evenly (static property)
        accumulate(hw_chunk)
    else:                            # ragged last spatial chunk: static masking
        @pl.when(k < nk - 1)
        def _():
            accumulate(hw_chunk)

        @pl.when(k == nk - 1)
        def _():
            accumulate(hw_last)

    @pl.when(k == nk - 1)
    def _():
        # One cross-lane reduce per batch tile, then the two MXU matmuls.
        pooled = jnp.sum(acc_ref[...], axis=-1) * inv_hw          # global avg pool
        h = jnp.dot(pooled, w1_ref[...].astype(jnp.float32),
                    preferred_element_type=jnp.float32) + b1_ref[...]
        h = jnp.maximum(h, 0.0)                                   # ReLU
        out = jnp.dot(h, w2_ref[...].astype(jnp.float32),
                      preferred_element_type=jnp.float32) + b2_ref[...]
        o_ref[...] = out.astype(o_ref.dtype)


def global_tree_differ_forward(x, w1, b1, w2, b2):
    """x: (N, C, H, W) -> (N, output_classes) float32."""
    N, C, H, W = x.shape
    HW = H * W
    HID = w1.shape[1]
    CLS = w2.shape[1]

    # Free reshape; no dtype cast and no padding copy of x in HBM.
    x_flat = x.reshape(N, C, HW)

    x_itemsize = jnp.dtype(x.dtype).itemsize
    sub = max(8, 32 // x_itemsize)          # sublane pad: f32->8, bf16->16, int8->32
    c_pad = _round_up(C, sub)

    cap = _vmem_capacity_bytes()

    # Grid-invariant VMEM residents (weights/biases double-buffered by default
    # pipeline; charged at 2x) + output double-buffer.
    w_bytes = 2 * (_tile_bytes(C, HID, w1.dtype) + _tile_bytes(1, HID, b1.dtype)
                   + _tile_bytes(HID, CLS, w2.dtype) + _tile_bytes(1, CLS, b2.dtype))

    PER_BUF_CAP = 4 << 20                   # per x buffer -> many batch programs
    acc_row = _round_up(C, 8) * 128 * 4     # f32 accumulator bytes per batch row

    # Spatial chunking only if a minimal batch tile over the full HW is too big.
    row_full = c_pad * _round_up(HW, 128) * x_itemsize
    tn_floor = min(N, 8)
    if tn_floor * row_full <= PER_BUF_CAP:
        HW_CHUNK = HW
    else:
        HW_CHUNK = (PER_BUF_CAP // (tn_floor * c_pad * x_itemsize)) // 128 * 128
        HW_CHUNK = int(max(128, min(HW_CHUNK, _round_up(HW, 128))))
        if HW_CHUNK >= HW:
            HW_CHUNK = HW

    row = c_pad * _round_up(HW_CHUNK, 128) * x_itemsize

    if N <= 8:
        TN = N                              # block spans the full batch dim
    else:
        budget = max(2 << 20, min(12 << 20, cap - w_bytes - (4 << 20)))
        tn = min(PER_BUF_CAP // row, budget // max(2 * row + acc_row, 1))
        tn = max(8, (int(tn) // 8) * 8)
        tn = min(tn, _round_up(_cdiv(N, 8), 8))   # keep >= ~8 batch programs
        TN = N if tn >= N else tn

    n_b = _cdiv(N, TN)
    n_k = _cdiv(HW, HW_CHUNK)
    hw_last = HW - (n_k - 1) * HW_CHUNK

    x_bytes = 2 * TN * c_pad * _round_up(HW_CHUNK, 128) * x_itemsize
    acc_bytes = TN * acc_row
    out_bytes = 2 * _tile_bytes(TN, CLS, jnp.float32)
    vmem_limit = min(cap, max(24 << 20,
                              x_bytes + acc_bytes + w_bytes + out_bytes + (8 << 20)))

    cost = pl.CostEstimate(
        flops=2 * N * C * HW + 2 * N * C * HID + 2 * N * HID * CLS,
        transcendentals=0,
        bytes_accessed=(N * C * HW * x_itemsize
                        + (C * HID + HID + HID * CLS + CLS + N * CLS) * 4),
    )

    kernel = functools.partial(_simclr_head_kernel, inv_hw=1.0 / HW,
                               hw_chunk=HW_CHUNK, hw_last=hw_last)

    return pl.pallas_call(
        kernel,
        out_shape=jax.ShapeDtypeStruct((N, CLS), jnp.float32),
        grid_spec=pltpu.PrefetchScalarGridSpec(
            num_scalar_prefetch=0,
            grid=(n_b, n_k),
            in_specs=[
                pl.BlockSpec((TN, C, HW_CHUNK), lambda i, k: (i, 0, k)),
                pl.BlockSpec((C, HID), lambda i, k: (0, 0)),
                pl.BlockSpec((1, HID), lambda i, k: (0, 0)),
                pl.BlockSpec((HID, CLS), lambda i, k: (0, 0)),
                pl.BlockSpec((1, CLS), lambda i, k: (0, 0)),
            ],
            out_specs=pl.BlockSpec((TN, CLS), lambda i, k: (i, 0)),
            scratch_shapes=[pltpu.VMEM((TN, C, 128), jnp.float32)],
        ),
        compiler_params=pltpu.CompilerParams(
            dimension_semantics=("parallel", "arbitrary"),
            vmem_limit_bytes=int(vmem_limit),
        ),
        cost_estimate=cost,
    )(x_flat, w1, b1, w2, b2)


def _reference(x, w1, b1, w2, b2):
    pooled = jnp.mean(x.reshape(x.shape[0], x.shape[1], -1), axis=-1)
    h = jnp.maximum(pooled @ w1 + b1, 0.0)
    return h @ w2 + b2


if __name__ == "__main__":
    # Small shapes consistent with the module's (input_channel, output_classes).
    N, C, H, W = 2, 4, 16, 16          # batch, input_channel, spatial
    HIDDEN, OUTPUT_CLASSES = 32, 8

    key = jax.random.PRNGKey(0)
    kx, kw1, kb1, kw2, kb2 = jax.random.split(key, 5)

    x = jax.random.normal(kx, (N, C, H, W), dtype=jnp.float32)
    w1 = jax.random.normal(kw1, (C, HIDDEN), dtype=jnp.float32) * 0.1
    b1 = jax.random.normal(kb1, (1, HIDDEN), dtype=jnp.float32) * 0.01
    w2 = jax.random.normal(kw2, (HIDDEN, OUTPUT_CLASSES), dtype=jnp.float32) * 0.1
    b2 = jax.random.normal(kb2, (1, OUTPUT_CLASSES), dtype=jnp.float32) * 0.01

    out = jax.block_until_ready(global_tree_differ_forward(x, w1, b1, w2, b2))
    ref = _reference(x, w1, b1, w2, b2)

    assert out.shape == (N, OUTPUT_CLASSES), out.shape
    assert jnp.allclose(out, ref, atol=1e-4, rtol=1e-4), "mismatch vs reference"

    print("KERNEL_OK")
</pallas_src>

<mosaic_0001>
module attributes {stable_mosaic.version = 11 : i64} {
  func.func @_simclr_head_kernel(%arg0: i32, %arg1: i32, %arg2: memref<2x4x256xf32, #tpu.memory_space<vmem>>, %arg3: memref<4x32xf32, #tpu.memory_space<vmem>>, %arg4: memref<1x32xf32, #tpu.memory_space<vmem>>, %arg5: memref<32x8xf32, #tpu.memory_space<vmem>>, %arg6: memref<1x8xf32, #tpu.memory_space<vmem>>, %arg7: memref<2x8xf32, #tpu.memory_space<vmem>>, %arg8: memref<2x4x128xf32, #tpu.memory_space<vmem>>) attributes {dimension_semantics = [#tpu.dimension_semantics<parallel>, #tpu.dimension_semantics<arbitrary>], iteration_bounds = array<i64: 1, 1>, scalar_prefetch = 0 : i64, scratch_operands = 1 : i64, tpu.core_type = #tpu.core_type<tc>, window_params = [{transform_indices = @transform_0, window_bounds = array<i64: 2, 4, 256>}, {pipeline_mode = #tpu.pipeline_mode<synchronous>, transform_indices = @transform_1, window_bounds = array<i64: 4, 32>}, {pipeline_mode = #tpu.pipeline_mode<synchronous>, transform_indices = @transform_2, window_bounds = array<i64: 1, 32>}, {pipeline_mode = #tpu.pipeline_mode<synchronous>, transform_indices = @transform_3, window_bounds = array<i64: 32, 8>}, {pipeline_mode = #tpu.pipeline_mode<synchronous>, transform_indices = @transform_4, window_bounds = array<i64: 1, 8>}, {transform_indices = @transform_5, window_bounds = array<i64: 2, 8>}]} {
    %c0_i32 = arith.constant 0 : i32
    %0 = arith.cmpi eq, %arg1, %c0_i32 : i32
    %1 = arith.extui %0 : i1 to i32
    %c0_i32_0 = arith.constant 0 : i32
    %2 = arith.cmpi ne, %1, %c0_i32_0 : i32
    scf.if %2 {
      %cst = arith.constant 0.000000e+00 : f32
      %14 = vector.broadcast %cst : f32 to vector<2x4x128xf32>
      %c0_19 = arith.constant 0 : index
      %c0_20 = arith.constant 0 : index
      %c0_21 = arith.constant 0 : index
      %15 = vector.load %arg8[%c0_19, %c0_20, %c0_21] : memref<2x4x128xf32, #tpu.memory_space<vmem>>, vector<2x4x128xf32>
      tpu.vector_store %arg8[%c0_19, %c0_20, %c0_21], %14 {strides = array<i32>} : memref<2x4x128xf32, #tpu.memory_space<vmem>>, vector<2x4x128xf32>,
    } else {
    }
    %c0 = arith.constant 0 : index
    %c0_1 = arith.constant 0 : index
    %c0_2 = arith.constant 0 : index
    %3 = vector.load %arg8[%c0, %c0_1, %c0_2] : memref<2x4x128xf32, #tpu.memory_space<vmem>>, vector<2x4x128xf32>
    %c0_3 = arith.constant 0 : index
    %c0_4 = arith.constant 0 : index
    %c0_5 = arith.constant 0 : index
    %4 = vector.load %arg2[%c0_3, %c0_4, %c0_5] : memref<2x4x256xf32, #tpu.memory_space<vmem>>, vector<2x4x128xf32>
    %5 = arith.addf %3, %4 : vector<2x4x128xf32>
    %c0_6 = arith.constant 0 : index
    %c0_7 = arith.constant 0 : index
    %c0_8 = arith.constant 0 : index
    %6 = vector.load %arg8[%c0_6, %c0_7, %c0_8] : memref<2x4x128xf32, #tpu.memory_space<vmem>>, vector<2x4x128xf32>
    tpu.vector_store %arg8[%c0_6, %c0_7, %c0_8], %5 {strides = array<i32>} : memref<2x4x128xf32, #tpu.memory_space<vmem>>, vector<2x4x128xf32>,
    %c0_9 = arith.constant 0 : index
    %c0_10 = arith.constant 0 : index
    %c0_11 = arith.constant 0 : index
    %7 = vector.load %arg8[%c0_9, %c0_10, %c0_11] : memref<2x4x128xf32, #tpu.memory_space<vmem>>, vector<2x4x128xf32>
    %c0_12 = arith.constant 0 : index
    %c0_13 = arith.constant 0 : index
    %c128 = arith.constant 128 : index
    %8 = vector.load %arg2[%c0_12, %c0_13, %c128] : memref<2x4x256xf32, #tpu.memory_space<vmem>>, vector<2x4x128xf32>
    %9 = arith.addf %7, %8 : vector<2x4x128xf32>
    %c0_14 = arith.constant 0 : index
    %c0_15 = arith.constant 0 : index
    %c0_16 = arith.constant 0 : index
    %10 = vector.load %arg8[%c0_14, %c0_15, %c0_16] : memref<2x4x128xf32, #tpu.memory_space<vmem>>, vector<2x4x128xf32>
    tpu.vector_store %arg8[%c0_14, %c0_15, %c0_16], %9 {strides = array<i32>} : memref<2x4x128xf32, #tpu.memory_space<vmem>>, vector<2x4x128xf32>,
    %c0_i32_17 = arith.constant 0 : i32
    %11 = arith.cmpi eq, %arg1, %c0_i32_17 : i32
    %12 = arith.extui %11 : i1 to i32
    %c0_i32_18 = arith.constant 0 : i32
    %13 = arith.cmpi ne, %12, %c0_i32_18 : i32
    scf.if %13 {
      %c0_19 = arith.constant 0 : index
      %c0_20 = arith.constant 0 : index
      %c0_21 = arith.constant 0 : index
      %14 = vector.load %arg8[%c0_19, %c0_20, %c0_21] : memref<2x4x128xf32, #tpu.memory_space<vmem>>, vector<2x4x128xf32>
      %cst = arith.constant dense<0.000000e+00> : vector<2x4xf32>
      %15 = vector.multi_reduction <add>, %14, %cst [2] : vector<2x4x128xf32> to vector<2x4xf32>
      %cst_22 = arith.constant 3.906250e-03 : f32
      %16 = vector.broadcast %cst_22 : f32 to vector<2x4xf32>
      %17 = arith.mulf %15, %16 : vector<2x4xf32>
      %c0_23 = arith.constant 0 : index
      %c0_24 = arith.constant 0 : index
      %18 = vector.load %arg3[%c0_23, %c0_24] : memref<4x32xf32, #tpu.memory_space<vmem>>, vector<4x32xf32>
      %cst_25 = arith.constant dense<0.000000e+00> : vector<2x32xf32>
      %19 = tpu.matmul %17, %18, %cst_25 {dimension_numbers = #tpu.dot_dimension_numbers<[1], [0], [0], [1], [0, 0, 1, 1], [], []>} : vector<2x4xf32>, vector<4x32xf32>, vector<2x32xf32> -> vector<2x32xf32>
      %c0_26 = arith.constant 0 : index
      %c0_27 = arith.constant 0 : index
      %20 = vector.load %arg4[%c0_26, %c0_27] : memref<1x32xf32, #tpu.memory_space<vmem>>, vector<1x32xf32>
      %21 = vector.broadcast %20 : vector<1x32xf32> to vector<2x32xf32>
      %22 = arith.addf %19, %21 : vector<2x32xf32>
      %cst_28 = arith.constant 0.000000e+00 : f32
      %23 = vector.broadcast %cst_28 : f32 to vector<2x32xf32>
      %24 = arith.maximumf %22, %23 : vector<2x32xf32>
      %c0_29 = arith.constant 0 : index
      %c0_30 = arith.constant 0 : index
      %25 = vector.load %arg5[%c0_29, %c0_30] : memref<32x8xf32, #tpu.memory_space<vmem>>, vector<32x8xf32>
      %cst_31 = arith.constant dense<0.000000e+00> : vector<2x8xf32>
      %26 = tpu.matmul %24, %25, %cst_31 {dimension_numbers = #tpu.dot_dimension_numbers<[1], [0], [0], [1], [0, 0, 1, 1], [], []>} : vector<2x32xf32>, vector<32x8xf32>, vector<2x8xf32> -> vector<2x8xf32>
      %c0_32 = arith.constant 0 : index
      %c0_33 = arith.constant 0 : index
      %27 = vector.load %arg6[%c0_32, %c0_33] : memref<1x8xf32, #tpu.memory_space<vmem>>, vector<1x8xf32>
      %28 = vector.broadcast %27 : vector<1x8xf32> to vector<2x8xf32>
      %29 = arith.addf %26, %28 : vector<2x8xf32>
      %c0_34 = arith.constant 0 : index
      %c0_35 = arith.constant 0 : index
      %30 = vector.load %arg7[%c0_34, %c0_35] : memref<2x8xf32, #tpu.memory_space<vmem>>, vector<2x8xf32>
      tpu.vector_store %arg7[%c0_34, %c0_35], %29 {strides = array<i32>} : memref<2x8xf32, #tpu.memory_space<vmem>>, vector<2x8xf32>,
    } else {
    }
    return
  }
  func.func @transform_0(%arg0: i32, %arg1: i32) -> (i32, i32, i32) {
    %c0_i32 = arith.constant 0 : i32
    %c0_i32_0 = arith.constant 0 : i32
    return %arg0, %c0_i32, %arg1 : i32, i32, i32
  }
  func.func @transform_1(%arg0: i32, %arg1: i32) -> (i32, i32) {
    %c0_i32 = arith.constant 0 : i32
    %c0_i32_0 = arith.constant 0 : i32
    %c0_i32_1 = arith.constant 0 : i32
    return %c0_i32, %c0_i32_0 : i32, i32
  }
  func.func @transform_2(%arg0: i32, %arg1: i32) -> (i32, i32) {
    %c0_i32 = arith.constant 0 : i32
    %c0_i32_0 = arith.constant 0 : i32
    %c0_i32_1 = arith.constant 0 : i32
    return %c0_i32, %c0_i32_0 : i32, i32
  }
  func.func @transform_3(%arg0: i32, %arg1: i32) -> (i32, i32) {
    %c0_i32 = arith.constant 0 : i32
    %c0_i32_0 = arith.constant 0 : i32
    %c0_i32_1 = arith.constant 0 : i32
    return %c0_i32, %c0_i32_0 : i32, i32
  }
  func.func @transform_4(%arg0: i32, %arg1: i32) -> (i32, i32) {
    %c0_i32 = arith.constant 0 : i32
    %c0_i32_0 = arith.constant 0 : i32
    %c0_i32_1 = arith.constant 0 : i32
    return %c0_i32, %c0_i32_0 : i32, i32
  }
  func.func @transform_5(%arg0: i32, %arg1: i32) -> (i32, i32) {
    %c0_i32 = arith.constant 0 : i32
    %c0_i32_0 = arith.constant 0 : i32
    return %arg0, %c0_i32 : i32, i32
  }
}

</mosaic_0001>

<bundles_post_ra>
// kernel: tpu_custom_call.1
= control target key start
LH: loop header
LB: loop body
LE: loop exit
PB: predicated region body
PF: predicated region fallthrough
CT: control target
= control target key end

     0   :  { %v310_v0 = vmov 0.0   ;;  %s379_s0 = inlined_call_operand.vmem [shape: f32[2,4,256], index: 0, kind: input, shape index: {}]   ;;  %s380_s1 = inlined_call_operand.vmem [shape: f32[4,32], index: 1, kind: input, shape index: {}]   ;;  %s381_s2 = inlined_call_operand.vmem [shape: f32[1,32], index: 2, kind: input, shape index: {}]   ;;  %s382_s3 = inlined_call_operand.vmem [shape: f32[32,8], index: 3, kind: input, shape index: {}]   ;;  %s383_s4 = inlined_call_operand.vmem [shape: f32[1,8], index: 4, kind: input, shape index: {}]   ;;  %s384_s5 = inlined_call_operand.hbm [shape: f32[2,8], index: 5, kind: output, shape index: {}]  }
   0x1   :  { %25 = vst [vmem:[#allocation2] sm:$0xf] %v310_v0  ;;  %26 = vst [vmem:[#allocation2 + $0x4] sm:$0xf] %v310_v0  ;;  %269 = vmatprep.subr.mxu0 %v310_v0  ;;  %274 = vmatprep.subr.mxu1 %v310_v0 }
   0x2   :  { %10 = vsyncpa [#allocation4], 0  ;;  %v29_v1 = vld [vmem:[%s379_s0] sm:$0xf]  ;;  %v30_v2 = vld [vmem:[%s379_s0 + $0x8] sm:$0xf]  ;;  %v67_v19 = vlaneseq }
   0x3   :  { %v37_v7 = vld [vmem:[%s379_s0 + $0x4] sm:$0xf]  ;;  %v38_v8 = vld [vmem:[%s379_s0 + $0xc] sm:$0xf]  ;;  %vm48_vm0 = vcmask 1043456   ;;  %vm311_vm1 = vmmov 0  }
   0x4   :  { %v57_v17 = vld [vmem:[%s380_s1] sm:$0xf]  ;;  %271 = vmatprep.mubr.msk.f32.mxu0 %vm311_vm1, %v310_v0  ;;  %282 = vmatprep.mubr.msk.f32.mxu1 %vm311_vm1, %v310_v0  ;;  %v159_v18 = vld [vmem:[%s382_s3 + $0x18] sm:$0xff]  ;;  %v68_v20 = vand.u32 127, %v67_v19  ;;  %v70_v21 = vshrl.u32 %v67_v19, 7  ;;  %vm77_vm2 = vcmask 1041409  }
   0x5   :  { %270 = vmatpush3.msk.msra.mxu0 %vm48_vm0, %v57_v17  ;;  %275 = vmatpush3.msra.mxu1 %v159_v18  ;;  %vm79_vm3 = vcmask 31744   ;;  %v158_v30 = vld [vmem:[%s382_s3 + $0x10] sm:$0xff]  ;;  %v157_v31 = vld [vmem:[%s382_s3 + $0x8] sm:$0xff]  ;;  %v156_v32 = vld [vmem:[%s382_s3] sm:$0xff]  ;;  %vm167_vm4 = vcmask 261120   ;;  %s312_s13 = smov [#allocation3]  }
   0x6   :  { %276 = vmatprep.subr.mxu1 %v310_v0  ;;  %v71_v23 = vsub.s32 %v68_v20, %v70_v21  ;;  %v257_v33 = vld [vmem:[%s381_s2] ss:$0 sm:$0xff]  ;;  %s249_s14 = sshll.u32 %s312_s13, 4  ;;  %vm241_vm5 = vcmask 58368   ;;  %s250_s14 = int_to_ptr.vmem [resolvable:$true] %s249_s14 }
   0x7   :  { %277 = vmatpush3.msra.mxu1 %v158_v30  ;;  %v260_v38 = vld [vmem:[%s383_s4] ss:$0 sm:$0xff]  ;;  %s288_s3 = scalar_lea.vmem %s250_s14, 32  ;;  %p293_p1 = scmp.lt.s32.totalorder %s250_s14, %s250_s14 }
   0x8   :  { %v27_v3 = vld [vmem:[#allocation2] sm:$0xf]  ;;  %v28_v4 = vld [vmem:[#allocation2 + $0x4] sm:$0xf]  ;;  %278 = vmatprep.subr.mxu1 %v310_v0  ;;  %p289_p0 = scmp.ne.s32.totalorder %s250_s14, %s288_s3  ;;  %p294_p2 = scmp.lt.s32.totalorder %s288_s3, %s288_s3 }
   0x9   :  { %v31_v5 = vadd.f32 %v29_v1, %v27_v3  ;;  %v32_v6 = vadd.f32 %v30_v2, %v28_v4  ;;  %279 = vmatpush3.msra.mxu1 %v157_v31 }
   0xa   :  { %280 = vmatprep.subr.mxu1 %v310_v0  ;;  %p295_p3 = por %p294_p2, %p293_p1 }
   0xb   :  { %33 = vst [vmem:[#allocation2] sm:$0xf] %v31_v5  ;;  %34 = vst [vmem:[#allocation2 + $0x4] sm:$0xf] %v32_v6  ;;  %281 = vmatpush3.msra.mxu1 %v156_v32 }
   0xc   :  { %p296_p4 = pnand %p295_p3, %p289_p0 }
  0x12   :  { %v35_v9 = vld [vmem:[#allocation2] sm:$0xf]  ;;  %v36_v10 = vld [vmem:[#allocation2 + $0x4] sm:$0xf] }
  0x13   :  { %v39_v11 = vadd.f32 %v37_v7, %v35_v9  ;;  %v40_v12 = vadd.f32 %v38_v8, %v36_v10 }
  0x15   :  { %41 = vst [vmem:[#allocation2] sm:$0xf] %v39_v11  ;;  %42 = vst [vmem:[#allocation2 + $0x4] sm:$0xf] %v40_v12 }
  0x1c   :  { %v46_v13 = vld [vmem:[#allocation2] sm:$0xf]  ;;  %v47_v14 = vld [vmem:[#allocation2 + $0x4] sm:$0xf] }
  0x1d   :  { %v49_v15 = vsel %vm48_vm0, %v46_v13, 0.0  ;;  %v52_v16 = vsel %vm48_vm0, %v47_v14, 0.0 }
  0x1e   :  { %50 = vadd.xlane.f32.xlu0 %v49_v15 }
  0x22   :  { %53 = vadd.xlane.f32.xlu0 %v52_v16 }
  0xa7   :  { %v51_v22 = vpop.xlane.xlu0 %50 }
  0xa8   :  { %v55_v24 = vmul.f32 0.00390625, %v51_v22 }
  0xaa   :  { %v72_v27 = vrot.slane %v55_v24, %v71_v23 }
  0xab   :  { %v54_v25 = vpop.xlane.xlu0 %53 }
  0xac   :  { %v56_v26 = vmul.f32 0.00390625, %v54_v25 }
  0xae   :  { %v76_v28 = vrot.slane %v56_v26, %v71_v23 }
  0xb0   :  { %v78_v29 = vsel %vm77_vm2, %v76_v28, %v72_v27 }
  0xb1   :  { %272 = vmatmul.mubr.msk.f32.vlgmr.msra.gmra.mxu0 %vm79_vm3, %v78_v29 }
 0x171   :  { %v151_v34 = vpop.f32.mrf.mxu0 }
 0x172   :  { %v152_v35 = vadd.f32 %v257_v33, %v151_v34 }
 0x173   :  { %v273_v36 = vpop.f32.mrf.mxu0 }
 0x174   :  { %v155_v37 = vmax.f32 %v152_v35, 0.0 }
 0x176   :  { %283 = vmatmul.mubr.msk.f32.vlgmr.msra.gmra.mxu1 %vm167_vm4, %v155_v37 }
 0x236   :  { %v237_v39 = vpop.f32.mrf.mxu1 }
 0x237   :  { %v238_v40 = vadd.f32 %v260_v38, %v237_v39 }
 0x238   :  { %v284_v41 = vpop.f32.mrf.mxu1 }
 0x239   :  { %242 = vst.msk [vmem:[#allocation3] sm:$0x3] %vm241_vm5, %v238_v40 }
 0x23a   :  { %299 = shalt.err (!%p296_p4)
}
 0x23b   :  { %252 = dma.vmem_to_hbm [thread:$0]  %s250_s14, 32, %s384_s5, [#allocation4]  }
 0x23c   :  { %308 = dma.done.wait [#allocation4], 32  }
 0x23d   :  { %309 = vsyncadd [#allocation4], 4294967264 }
 0x23e   :  { %256 = vsyncpa [#allocation4], 1 }

</bundles_post_ra>
